<compile_context>
chip_gen: v7x
topology: tpu7x:2x2x1
jax: 0.10.0
libtpu: 0.0.40
codegen_flags: <defaults>
</compile_context>

<pallas_src>
import jax
import jax.numpy as jnp
from jax.experimental import pallas as pl
from jax.experimental.pallas import tpu as pltpu


def ssl_evaluator_kernel(x_ref, w1_ref, b1_ref, w2_ref, b2_ref, out_ref):
    """Fused MLP head on one batch tile.

    x_ref:   (TB, in_dim)    native dtype (cast to bf16 in-kernel)
    w1_ref:  (in_dim, hid)   bf16   (BN already folded in)
    b1_ref:  (1, hid)        f32    (folded BN bias)
    w2_ref:  (hid, OUT_PAD)  bf16   (zero-padded columns)
    b2_ref:  (1, OUT_PAD)    f32    (-1e30 on padded columns)
    out_ref: (TB, OUT_PAD)   f32    softmax probabilities (padded cols -> 0)
    """
    # Linear(+folded BN) -> ReLU.  In-kernel bf16 cast of x hides under DMA/MXU.
    x = x_ref[...].astype(jnp.bfloat16)
    h = jnp.dot(x, w1_ref[...], preferred_element_type=jnp.float32)
    h = jnp.maximum(h + b1_ref[...], jnp.float32(0.0))

    # Second Linear (lane-dense, padded to a 128-lane multiple), bias in epilogue.
    logits = jnp.dot(h.astype(jnp.bfloat16), w2_ref[...],
                     preferred_element_type=jnp.float32) + b2_ref[...]

    # Numerically stable softmax over the lane axis.  Padded lanes carry a
    # -1e30 bias so exp() underflows to exactly 0.  Exact division (not approx
    # reciprocal) so each row sums to 1 to f32 rounding.
    m = jnp.max(logits, axis=1, keepdims=True)
    e = jnp.exp(logits - m)
    denom = jnp.sum(e, axis=1, keepdims=True)
    out_ref[...] = (e / denom).astype(out_ref.dtype)


def _choose_tb(batch, in_dim, x_itemsize):
    """Batch tile: multiple of 8 (sublanes), sized so the per-step x DMA is ~2 MiB,
    capped so at least two tiles exist (v7x megacore) and tb <= batch."""
    if batch <= 8:
        return batch                                   # one tile == full batch dim
    max_tile = (batch // 8) * 8                        # largest multiple of 8 <= batch
    target = (2 * 1024 * 1024) // max(1, in_dim * x_itemsize)
    tb = max(8, min(1024, (target // 8) * 8))
    half = max(8, ((-(-batch // 2) + 7) // 8) * 8)     # ceil(batch/2) rounded up to 8
    return max(8, min(tb, half, max_tile))


def _resident_spec(shape):
    """Constant-index (weight) block: single-buffered to halve its VMEM footprint."""
    try:
        return pl.BlockSpec(shape, lambda i: (0, 0), pipeline_mode=pl.Buffered(1))
    except (TypeError, AttributeError):  # older JAX without pipeline_mode support
        return pl.BlockSpec(shape, lambda i: (0, 0))


def ssl_evaluator_forward(x_nchw, params):
    """Flatten NCHW input, fold BN into Linear-1, pad out_dim, run the fused kernel."""
    B = x_nchw.shape[0]
    x2 = x_nchw.reshape(B, -1)                                 # nn.Flatten(), no cast

    w1, gamma, beta, mean, var, w2, b2 = params
    in_dim, hid = w1.shape
    out_dim = w2.shape[1]

    # --- Fold BatchNorm1d (eval) into the first Linear (trace-time, free) ---
    eps = jnp.float32(1e-5)
    scale = gamma * jax.lax.rsqrt(var + eps)                   # (1, hid)
    w1_f = (w1 * scale).astype(jnp.bfloat16)                   # (in_dim, hid)
    b1_f = (beta - mean * scale).astype(jnp.float32)           # (1, hid)

    # --- Pad out_dim to a lane-dense multiple of 128 ---
    out_pad = max(128, ((out_dim + 127) // 128) * 128)
    w2_p = jnp.zeros((hid, out_pad), jnp.float32).at[:, :out_dim].set(w2)
    w2_p = w2_p.astype(jnp.bfloat16)
    b2_p = jnp.full((1, out_pad), -1e30, jnp.float32).at[:, :out_dim].set(b2)

    # --- Batch tiling: cdiv grid, ragged last tile handled by Pallas (no pad) ---
    x_itemsize = jnp.dtype(x2.dtype).itemsize
    tb = _choose_tb(B, in_dim, x_itemsize)
    n_b = pl.cdiv(B, tb)

    # --- VMEM limit derived from the actual buffers (conservative 2x buffering) ---
    need = 2 * (tb * in_dim * x_itemsize      # x tile
                + in_dim * hid * 2            # w1 (bf16)
                + hid * 4                     # b1
                + hid * out_pad * 2           # w2 (bf16)
                + out_pad * 4                 # b2
                + tb * out_pad * 4)           # out tile (f32)
    try:
        vmem_cap = int(pltpu.get_tpu_info().vmem_capacity_bytes)
    except Exception:                         # interpret mode / non-TPU backend
        vmem_cap = 64 * 1024 * 1024
    vmem_limit = int(min(vmem_cap * 3 // 4,
                         max(need * 5 // 4, 16 * 1024 * 1024)))

    # TODO(synk): for very large in_dim (flattened backbone features) add an
    # innermost "arbitrary" K-reduction grid axis with an f32 VMEM accumulator
    # for h instead of keeping all of w1 resident (needed on v7x's 64 MiB VMEM).

    out = pl.pallas_call(
        ssl_evaluator_kernel,
        out_shape=jax.ShapeDtypeStruct((B, out_pad), jnp.float32),
        grid_spec=pltpu.PrefetchScalarGridSpec(
            num_scalar_prefetch=0,
            grid=(n_b,),
            in_specs=[
                pl.BlockSpec((tb, in_dim), lambda i: (i, 0)),   # x tile (pipelined)
                _resident_spec((in_dim, hid)),                  # w1 (resident)
                _resident_spec((1, hid)),                       # b1 (resident)
                _resident_spec((hid, out_pad)),                 # w2 (resident)
                _resident_spec((1, out_pad)),                   # b2 (resident)
            ],
            out_specs=pl.BlockSpec((tb, out_pad), lambda i: (i, 0)),
        ),
        compiler_params=pltpu.CompilerParams(
            dimension_semantics=("parallel",),   # megacore sharding on v7x
            vmem_limit_bytes=vmem_limit,
        ),
    )(x2, w1_f, b1_f, w2_p, b2_p)

    return out[:, :out_dim]


def init_params(key, in_dim, hid_dim, out_dim):
    """Deterministic synthetic init mirroring PyTorch default shapes."""
    k1, k2, k3 = jax.random.split(key, 3)
    b1 = 1.0 / jnp.sqrt(jnp.float32(in_dim))
    w1 = jax.random.uniform(k1, (in_dim, hid_dim), jnp.float32, -b1, b1)
    b2s = 1.0 / jnp.sqrt(jnp.float32(hid_dim))
    w2 = jax.random.uniform(k2, (hid_dim, out_dim), jnp.float32, -b2s, b2s)
    b2 = jax.random.uniform(k3, (1, out_dim), jnp.float32, -b2s, b2s)
    # BatchNorm1d defaults: gamma=1, beta=0, running_mean=0, running_var=1
    gamma = jnp.ones((1, hid_dim), jnp.float32)
    beta = jnp.zeros((1, hid_dim), jnp.float32)
    mean = jnp.zeros((1, hid_dim), jnp.float32)
    var = jnp.ones((1, hid_dim), jnp.float32)
    return (w1, gamma, beta, mean, var, w2, b2)


def reference_forward(x_nchw, params):
    """Pure-JAX f32 reference of the PyTorch eval-mode forward."""
    w1, gamma, beta, mean, var, w2, b2 = params
    x = x_nchw.reshape(x_nchw.shape[0], -1).astype(jnp.float32)
    h = x @ w1
    h = (h - mean) / jnp.sqrt(var + 1e-5) * gamma + beta
    h = jnp.maximum(h, 0.0)
    logits = h @ w2 + b2
    return jax.nn.softmax(logits, axis=1)


if __name__ == "__main__":
    # Small shapes consistent with the module: B=8, C=4, H=W=16 -> in_dim=1024
    B, C, H, W = 8, 4, 16, 16
    in_dim = C * H * W          # 1024
    hid_dim = 128
    out_dim = 16

    key = jax.random.PRNGKey(0)
    kx, kp = jax.random.split(key)
    x = jax.random.normal(kx, (B, C, H, W), jnp.float32)
    params = init_params(kp, in_dim, hid_dim, out_dim)

    out = ssl_evaluator_forward(x, params)
    out = jax.block_until_ready(out)

    ref = reference_forward(x, params)
    assert out.shape == (B, out_dim)
    # bf16 matmul operands -> ~3 significant digits vs the f32 reference.
    assert jnp.allclose(out, ref, atol=5e-3, rtol=0.0), "mismatch vs JAX reference"
    # exact softmax division -> rows sum to 1 to f32 rounding (padded cols are 0)
    assert jnp.allclose(jnp.sum(out, axis=1), 1.0, atol=1e-3)

    print("KERNEL_OK")
</pallas_src>

<mosaic_0001>
module attributes {stable_mosaic.version = 11 : i64} {
  func.func @ssl_evaluator_kernel(%arg0: i32, %arg1: memref<8x1024xf32, #tpu.memory_space<vmem>>, %arg2: memref<1024x128xbf16, #tpu.memory_space<vmem>>, %arg3: memref<1x128xf32, #tpu.memory_space<vmem>>, %arg4: memref<128x128xbf16, #tpu.memory_space<vmem>>, %arg5: memref<1x128xf32, #tpu.memory_space<vmem>>, %arg6: memref<8x128xf32, #tpu.memory_space<vmem>>) attributes {dimension_semantics = [#tpu.dimension_semantics<parallel>], iteration_bounds = array<i64: 1>, scalar_prefetch = 0 : i64, scratch_operands = 0 : i64, tpu.core_type = #tpu.core_type<tc>, window_params = [{transform_indices = @transform_0, window_bounds = array<i64: 8, 1024>}, {pipeline_mode = #tpu.pipeline_mode<synchronous>, transform_indices = @transform_1, window_bounds = array<i64: 1024, 128>}, {pipeline_mode = #tpu.pipeline_mode<synchronous>, transform_indices = @transform_2, window_bounds = array<i64: 1, 128>}, {pipeline_mode = #tpu.pipeline_mode<synchronous>, transform_indices = @transform_3, window_bounds = array<i64: 128, 128>}, {pipeline_mode = #tpu.pipeline_mode<synchronous>, transform_indices = @transform_4, window_bounds = array<i64: 1, 128>}, {transform_indices = @transform_5, window_bounds = array<i64: 8, 128>}]} {
    %c0 = arith.constant 0 : index
    %c0_0 = arith.constant 0 : index
    %0 = vector.load %arg1[%c0, %c0_0] : memref<8x1024xf32, #tpu.memory_space<vmem>>, vector<8x1024xf32>
    %1 = arith.truncf %0 : vector<8x1024xf32> to vector<8x1024xbf16>
    %c0_1 = arith.constant 0 : index
    %c0_2 = arith.constant 0 : index
    %2 = vector.load %arg2[%c0_1, %c0_2] : memref<1024x128xbf16, #tpu.memory_space<vmem>>, vector<1024x128xbf16>
    %cst = arith.constant dense<0.000000e+00> : vector<8x128xf32>
    %3 = tpu.matmul %1, %2, %cst {dimension_numbers = #tpu.dot_dimension_numbers<[1], [0], [0], [1], [0, 0, 1, 1], [], []>} : vector<8x1024xbf16>, vector<1024x128xbf16>, vector<8x128xf32> -> vector<8x128xf32>
    %c0_3 = arith.constant 0 : index
    %c0_4 = arith.constant 0 : index
    %4 = vector.load %arg3[%c0_3, %c0_4] : memref<1x128xf32, #tpu.memory_space<vmem>>, vector<1x128xf32>
    %5 = vector.broadcast %4 : vector<1x128xf32> to vector<8x128xf32>
    %6 = arith.addf %3, %5 : vector<8x128xf32>
    %cst_5 = arith.constant 0.000000e+00 : f32
    %7 = vector.broadcast %cst_5 : f32 to vector<8x128xf32>
    %8 = arith.maximumf %6, %7 : vector<8x128xf32>
    %9 = arith.truncf %8 : vector<8x128xf32> to vector<8x128xbf16>
    %c0_6 = arith.constant 0 : index
    %c0_7 = arith.constant 0 : index
    %10 = vector.load %arg4[%c0_6, %c0_7] : memref<128x128xbf16, #tpu.memory_space<vmem>>, vector<128x128xbf16>
    %cst_8 = arith.constant dense<0.000000e+00> : vector<8x128xf32>
    %11 = tpu.matmul %9, %10, %cst_8 {dimension_numbers = #tpu.dot_dimension_numbers<[1], [0], [0], [1], [0, 0, 1, 1], [], []>} : vector<8x128xbf16>, vector<128x128xbf16>, vector<8x128xf32> -> vector<8x128xf32>
    %c0_9 = arith.constant 0 : index
    %c0_10 = arith.constant 0 : index
    %12 = vector.load %arg5[%c0_9, %c0_10] : memref<1x128xf32, #tpu.memory_space<vmem>>, vector<1x128xf32>
    %13 = vector.broadcast %12 : vector<1x128xf32> to vector<8x128xf32>
    %14 = arith.addf %11, %13 : vector<8x128xf32>
    %cst_11 = arith.constant dense<0xFF800000> : vector<8xf32>
    %15 = vector.multi_reduction <maximumf>, %14, %cst_11 [1] : vector<8x128xf32> to vector<8xf32>
    %16 = vector.shape_cast %15 : vector<8xf32> to vector<8x1xf32>
    %17 = vector.broadcast %16 : vector<8x1xf32> to vector<8x128xf32>
    %18 = arith.subf %14, %17 : vector<8x128xf32>
    %19 = math.exp %18 : vector<8x128xf32>
    %cst_12 = arith.constant dense<0.000000e+00> : vector<8xf32>
    %20 = vector.multi_reduction <add>, %19, %cst_12 [1] : vector<8x128xf32> to vector<8xf32>
    %21 = vector.shape_cast %20 : vector<8xf32> to vector<8x1xf32>
    %22 = vector.broadcast %21 : vector<8x1xf32> to vector<8x128xf32>
    %23 = arith.divf %19, %22 : vector<8x128xf32>
    %c0_13 = arith.constant 0 : index
    %c0_14 = arith.constant 0 : index
    %24 = vector.load %arg6[%c0_13, %c0_14] : memref<8x128xf32, #tpu.memory_space<vmem>>, vector<8x128xf32>
    tpu.vector_store %arg6[%c0_13, %c0_14], %23 {strides = array<i32>} : memref<8x128xf32, #tpu.memory_space<vmem>>, vector<8x128xf32>,
    return
  }
  func.func @transform_0(%arg0: i32) -> (i32, i32) {
    %c0_i32 = arith.constant 0 : i32
    %c0_i32_0 = arith.constant 0 : i32
    return %arg0, %c0_i32 : i32, i32
  }
  func.func @transform_1(%arg0: i32) -> (i32, i32) {
    %c0_i32 = arith.constant 0 : i32
    %c0_i32_0 = arith.constant 0 : i32
    %c0_i32_1 = arith.constant 0 : i32
    return %c0_i32, %c0_i32_0 : i32, i32
  }
  func.func @transform_2(%arg0: i32) -> (i32, i32) {
    %c0_i32 = arith.constant 0 : i32
    %c0_i32_0 = arith.constant 0 : i32
    %c0_i32_1 = arith.constant 0 : i32
    return %c0_i32, %c0_i32_0 : i32, i32
  }
  func.func @transform_3(%arg0: i32) -> (i32, i32) {
    %c0_i32 = arith.constant 0 : i32
    %c0_i32_0 = arith.constant 0 : i32
    %c0_i32_1 = arith.constant 0 : i32
    return %c0_i32, %c0_i32_0 : i32, i32
  }
  func.func @transform_4(%arg0: i32) -> (i32, i32) {
    %c0_i32 = arith.constant 0 : i32
    %c0_i32_0 = arith.constant 0 : i32
    %c0_i32_1 = arith.constant 0 : i32
    return %c0_i32, %c0_i32_0 : i32, i32
  }
  func.func @transform_5(%arg0: i32) -> (i32, i32) {
    %c0_i32 = arith.constant 0 : i32
    %c0_i32_0 = arith.constant 0 : i32
    return %arg0, %c0_i32 : i32, i32
  }
}

</mosaic_0001>

<bundles_post_ra>
// kernel: tpu_custom_call.1
= control target key start
LH: loop header
LB: loop body
LE: loop exit
PB: predicated region body
PF: predicated region fallthrough
CT: control target
= control target key end

     0   :  { %10 = vsyncpa [#allocation3], 0  ;;  %s1362_s0 = inlined_call_operand.hbm [shape: f32[8,1024], index: 0, kind: input, shape index: {}]   ;;  %s1363_s1 = inlined_call_operand.hbm [shape: bf16[1024,128], index: 1, kind: input, shape index: {}]   ;;  %s1364_s2 = inlined_call_operand.vmem [shape: f32[1,128], index: 2, kind: input, shape index: {}]   ;;  %s1365_s3 = inlined_call_operand.hbm [shape: bf16[128,128], index: 3, kind: input, shape index: {}]   ;;  %s1366_s4 = inlined_call_operand.vmem [shape: f32[1,128], index: 4, kind: input, shape index: {}]   ;;  %s1367_s5 = inlined_call_operand.hbm [shape: f32[8,128], index: 5, kind: output, shape index: {}]  }
   0x1   :  { %11 = vsyncpa [#allocation6], 0 }
   0x2   :  { %12 = vsyncpa [#allocation4], 0  ;;  %s1264_s18 = smov [#allocation5]   ;;  %s1170_s22 = scalar_lea.hbm %s1363_s1, 8192 }
   0x3   :  { %s28_s19 = sshll.u32 %s1264_s18, 4  ;;  %p1171_p0 = scmp.ne.s32.totalorder %s1363_s1, %s1170_s22  ;;  %s29_s19 = int_to_ptr.vmem [resolvable:$true] %s28_s19 }
   0x4   :  { %p1174_p1 = scmp.lt.u32.totalorder %s1170_s22, %s1363_s1 }
   0x6   :  { %p1176_p2 = pnand %p1174_p1, %p1171_p0 }
   0x8   :  { %1179 = shalt.err (!%p1176_p2)
}
   0x9   :  { %s1180_s27 = scalar_lea.vmem %s29_s19, 8192  ;;  %p1185_p4 = scmp.lt.s32.totalorder %s29_s19, %s29_s19 }
   0xa   :  { %p1181_p3 = scmp.ne.s32.totalorder %s29_s19, %s1180_s27  ;;  %p1186_p5 = scmp.lt.s32.totalorder %s1180_s27, %s1180_s27 }
   0xc   :  { %p1187_p6 = por %p1186_p5, %p1185_p4 }
   0xe   :  { %p1188_p7 = pnand %p1187_p6, %p1181_p3 }
  0x10   :  { %1191 = shalt.err (!%p1188_p7)
}
  0x11   :  { %s1265_s28 = smov 64   ;;  %s1266_s29 = smov 4  }
  0x12   :  { %34 = dma.hbm_to_vmem [thread:$0]  %s1363_s1, 8192, %s29_s19, [#allocation6], %s1265_s28, %s1265_s28, %s1266_s29  }
  0x13   :  { %s1267_s7 = smov [#allocation2]   ;;  %s1268_s9 = smov [#allocation7]  }
  0x14   :  { %s19_s8 = sshll.u32 %s1267_s7, 4  ;;  %s42_s10 = sshll.u32 %s1268_s9, 4  ;;  %s20_s8 = int_to_ptr.vmem [resolvable:$true] %s19_s8  ;;  %s43_s10 = int_to_ptr.vmem [resolvable:$true] %s42_s10 }
  0x15   :  { %s1192_s13 = scalar_lea.hbm %s1362_s0, 1024 }
  0x16   :  { %p1193_p8 = scmp.ne.s32.totalorder %s1362_s0, %s1192_s13  ;;  %p1196_p9 = scmp.lt.u32.totalorder %s1192_s13, %s1362_s0 }
  0x18   :  { %p1198_p10 = pnand %p1196_p9, %p1193_p8 }
  0x1a   :  { %1201 = shalt.err (!%p1198_p10)
}
  0x1b   :  { %s1202_s1 = scalar_lea.vmem %s20_s8, 1024  ;;  %p1207_p12 = scmp.lt.s32.totalorder %s20_s8, %s20_s8 }
  0x1c   :  { %p1203_p11 = scmp.ne.s32.totalorder %s20_s8, %s1202_s1  ;;  %p1208_p13 = scmp.lt.s32.totalorder %s1202_s1, %s1202_s1 }
  0x1e   :  { %p1209_p0 = por %p1208_p13, %p1207_p12 }
  0x20   :  { %p1210_p1 = pnand %p1209_p0, %p1203_p11 }
  0x22   :  { %1213 = shalt.err (!%p1210_p1)
}
  0x23   :  { %22 = dma.hbm_to_vmem [thread:$0]  %s1362_s0, 1024, %s20_s8, [#allocation3]  }
  0x24   :  { %s1214_s22 = scalar_lea.hbm %s1365_s3, 1024 }
  0x25   :  { %p1215_p2 = scmp.ne.s32.totalorder %s1365_s3, %s1214_s22  ;;  %p1218_p3 = scmp.lt.u32.totalorder %s1214_s22, %s1365_s3 }
  0x27   :  { %p1220_p4 = pnand %p1218_p3, %p1215_p2 }
  0x29   :  { %1223 = shalt.err (!%p1220_p4)
}
  0x2a   :  { %s1224_s27 = scalar_lea.vmem %s43_s10, 1024  ;;  %p1229_p6 = scmp.lt.s32.totalorder %s43_s10, %s43_s10 }
  0x2b   :  { %p1225_p5 = scmp.ne.s32.totalorder %s43_s10, %s1224_s27  ;;  %p1230_p7 = scmp.lt.s32.totalorder %s1224_s27, %s1224_s27 }
  0x2d   :  { %p1231_p8 = por %p1230_p7, %p1229_p6 }
  0x2f   :  { %p1232_p9 = pnand %p1231_p8, %p1225_p5 }
  0x31   :  { %1235 = shalt.err (!%p1232_p9)
}
  0x32   :  { %48 = dma.hbm_to_vmem [thread:$0]  %s1365_s3, 1024, %s43_s10, [#allocation6], %s1265_s28, %s1265_s28, %s1266_s29  }
  0x33   :  { %1258 = dma.done.wait [#allocation3], 1024  }
  0x34   :  { %1259 = vsyncadd [#allocation3], 4294966272 }
  0x35   :  { %1260 = dma.done.wait [#allocation6], 9216  }
  0x36   :  { %1261 = vsyncadd [#allocation6], 4294958080  ;;  %v1094_v0 = vld [vmem:[#allocation5 + $0x40] sm:$0xff]   ;;  %v1098_v4 = vld [vmem:[#allocation5 + $0x48] sm:$0xff]   ;;  %vm1270_vm0 = vmmov 0   ;;  %s1271_s6 = smov [#allocation8]  }
  0x37   :  { %v1095_v1 = vld [vmem:[#allocation5 + $0xc0] sm:$0xff]   ;;  %969 = vmatprep.subr.bf16.mxu0 %v1094_v0  ;;  %v1099_v5 = vld [vmem:[#allocation5 + $0xc8] sm:$0xff]   ;;  %v1102_v8 = vld [vmem:[#allocation5 + $0x50] sm:$0xff]   ;;  %s885_s7 = sshll.u32 %s1271_s6, 4  ;;  %s886_s7 = int_to_ptr.vmem [resolvable:$true] %s885_s7 }
  0x38   :  { %v1096_v2 = vld [vmem:[#allocation5] sm:$0xff]   ;;  %991 = vmatprep.subr.bf16.mxu1 %v1095_v1  ;;  %v1100_v6 = vld [vmem:[#allocation5 + $0x8] sm:$0xff]   ;;  %v1103_v9 = vld [vmem:[#allocation5 + $0xd0] sm:$0xff]   ;;  %p1241_p11 = scmp.lt.s32.totalorder %s886_s7, %s886_s7 }
  0x39   :  { %v1097_v3 = vld [vmem:[#allocation5 + $0x80] sm:$0xff]   ;;  %970 = vmatpush3.bf16.msra.mxu0 %v1096_v2  ;;  %v1101_v7 = vld [vmem:[#allocation5 + $0x88] sm:$0xff]   ;;  %v1104_v10 = vld [vmem:[#allocation5 + $0x10] sm:$0xff]  }
  0x3a   :  { %992 = vmatpush3.bf16.msra.mxu1 %v1097_v3  ;;  %971 = vmatprep.subr.bf16.mxu0 %v1098_v4  ;;  %v1105_v11 = vld [vmem:[#allocation5 + $0x90] sm:$0xff]   ;;  %v1106_v12 = vld [vmem:[#allocation5 + $0x58] sm:$0xff]   ;;  %v1110_v16 = vld [vmem:[#allocation5 + $0x60] sm:$0xff]  }
  0x3b   :  { %993 = vmatprep.subr.bf16.mxu1 %v1099_v5  ;;  %v1107_v13 = vld [vmem:[#allocation5 + $0xd8] sm:$0xff]   ;;  %v1111_v17 = vld [vmem:[#allocation5 + $0xe0] sm:$0xff]   ;;  %v1114_v20 = vld [vmem:[#allocation5 + $0x68] sm:$0xff]  }
  0x3c   :  { %v1108_v14 = vld [vmem:[#allocation5 + $0x18] sm:$0xff]   ;;  %v1112_v18 = vld [vmem:[#allocation5 + $0x20] sm:$0xff]   ;;  %v1115_v21 = vld [vmem:[#allocation5 + $0xe8] sm:$0xff]  }
  0x3d   :  { %972 = vmatpush3.bf16.msra.mxu0 %v1100_v6  ;;  %v1109_v15 = vld [vmem:[#allocation5 + $0x98] sm:$0xff]   ;;  %v1113_v19 = vld [vmem:[#allocation5 + $0xa0] sm:$0xff]   ;;  %v1116_v22 = vld [vmem:[#allocation5 + $0x28] sm:$0xff]  }
  0x3e   :  { %994 = vmatpush3.bf16.msra.mxu1 %v1101_v7  ;;  %973 = vmatprep.subr.bf16.mxu0 %v1102_v8  ;;  %v1117_v23 = vld [vmem:[#allocation5 + $0xa8] sm:$0xff]   ;;  %v1118_v24 = vld [vmem:[#allocation5 + $0x70] sm:$0xff]   ;;  %v1122_v28 = vld [vmem:[#allocation5 + $0x78] sm:$0xff]  }
  0x3f   :  { %995 = vmatprep.subr.bf16.mxu1 %v1103_v9  ;;  %v1119_v25 = vld [vmem:[#allocation5 + $0xf0] sm:$0xff]   ;;  %v1123_v29 = vld [vmem:[#allocation5 + $0xf8] sm:$0xff]   ;;  %v62_v32 = vld [vmem:[#allocation2 + $0x8] sm:$0xff] }
  0x40   :  { %v1120_v26 = vld [vmem:[#allocation5 + $0x30] sm:$0xff]   ;;  %v1124_v30 = vld [vmem:[#allocation5 + $0x38] sm:$0xff]   ;;  %v61_v34 = vld [vmem:[#allocation2] sm:$0xff]  ;;  %v70_v35 = vpack.c.bf16 %v62_v32, %v62_v32 }
  0x41   :  { %974 = vmatpush3.bf16.msra.mxu0 %v1104_v10  ;;  %v1121_v27 = vld [vmem:[#allocation5 + $0xb0] sm:$0xff]   ;;  %v1125_v31 = vld [vmem:[#allocation5 + $0xb8] sm:$0xff]   ;;  %v69_v37 = vpack.c.bf16 %v61_v34, %v61_v34  ;;  %v1126_v40 = vld [vmem:[#allocation5 + $0x140] sm:$0xff]  }
  0x42   :  { %996 = vmatpush3.bf16.msra.mxu1 %v1105_v11  ;;  %975 = vmatprep.subr.bf16.mxu0 %v1106_v12  ;;  %v64_v33 = vld [vmem:[#allocation2 + $0x18] sm:$0xff]  ;;  %v63_v38 = vld [vmem:[#allocation2 + $0x10] sm:$0xff]  ;;  %v1127_v41 = vld [vmem:[#allocation5 + $0x1c0] sm:$0xff]  }
  0x43   :  { %997 = vmatprep.subr.bf16.mxu1 %v1107_v13  ;;  %v72_v36 = vpack.c.bf16 %v64_v33, %v64_v33  ;;  %v71_v39 = vpack.c.bf16 %v63_v38, %v63_v38  ;;  %628 = vmatprep.mubr.bf16.mxu0 %v70_v35  ;;  %v1128_v42 = vld [vmem:[#allocation5 + $0x100] sm:$0xff]   ;;  %v1130_v44 = vld [vmem:[#allocation5 + $0x148] sm:$0xff]   ;;  %v1134_v48 = vld [vmem:[#allocation5 + $0x150] sm:$0xff]  }
  0x44   :  { %v1129_v43 = vld [vmem:[#allocation5 + $0x180] sm:$0xff]   ;;  %v1131_v45 = vld [vmem:[#allocation5 + $0x1c8] sm:$0xff]   ;;  %v1135_v49 = vld [vmem:[#allocation5 + $0x1d0] sm:$0xff]  }
  0x45   :  { %976 = vmatpush3.bf16.msra.mxu0 %v1108_v14  ;;  %668 = vmatprep.mubr.bf16.mxu1 %v72_v36  ;;  %v1132_v46 = vld [vmem:[#allocation5 + $0x108] sm:$0xff]   ;;  %v1136_v50 = vld [vmem:[#allocation5 + $0x110] sm:$0xff]   ;;  %v1138_v52 = vld [vmem:[#allocation5 + $0x158] sm:$0xff]  }
  0x46   :  { %998 = vmatpush3.bf16.msra.mxu1 %v1109_v15  ;;  %977 = vmatprep.subr.bf16.mxu0 %v1110_v16  ;;  %v1133_v47 = vld [vmem:[#allocation5 + $0x188] sm:$0xff]   ;;  %v1137_v51 = vld [vmem:[#allocation5 + $0x190] sm:$0xff]   ;;  %v1139_v53 = vld [vmem:[#allocation5 + $0x1d8] sm:$0xff]  }
  0x47   :  { %999 = vmatprep.subr.bf16.mxu1 %v1111_v17  ;;  %v1140_v54 = vld [vmem:[#allocation5 + $0x118] sm:$0xff]   ;;  %v1142_v56 = vld [vmem:[#allocation5 + $0x160] sm:$0xff]   ;;  %v1146_v60 = vld [vmem:[#allocation5 + $0x168] sm:$0xff]   ;;  %v1269_v17 = vmov 0.0  }
  0x48   :  { %v1141_v55 = vld [vmem:[#allocation5 + $0x198] sm:$0xff]   ;;  %v1143_v57 = vld [vmem:[#allocation5 + $0x1e0] sm:$0xff]   ;;  %v1147_v61 = vld [vmem:[#allocation5 + $0x1e8] sm:$0xff]  }
  0x49   :  { %978 = vmatpush3.bf16.msra.mxu0 %v1112_v18  ;;  %v1144_v58 = vld [vmem:[#allocation5 + $0x120] sm:$0xff]   ;;  %v1148_v62 = vld [vmem:[#allocation5 + $0x128] sm:$0xff]   ;;  %v1150_v0 = vld [vmem:[#allocation5 + $0x170] sm:$0xff]  }
  0x4a   :  { %1000 = vmatpush3.bf16.msra.mxu1 %v1113_v19  ;;  %979 = vmatprep.subr.bf16.mxu0 %v1114_v20  ;;  %v1145_v59 = vld [vmem:[#allocation5 + $0x1a0] sm:$0xff]   ;;  %v1149_v63 = vld [vmem:[#allocation5 + $0x1a8] sm:$0xff]   ;;  %v1151_v1 = vld [vmem:[#allocation5 + $0x1f0] sm:$0xff]  }
  0x4b   :  { %1001 = vmatprep.subr.bf16.mxu1 %v1115_v21  ;;  %v1152_v2 = vld [vmem:[#allocation5 + $0x130] sm:$0xff]   ;;  %v1154_v4 = vld [vmem:[#allocation5 + $0x178] sm:$0xff]   ;;  %v66_v8 = vld [vmem:[#allocation2 + $0x28] sm:$0xff] }
  0x4c   :  { %v1153_v3 = vld [vmem:[#allocation5 + $0x1b0] sm:$0xff]   ;;  %v1155_v5 = vld [vmem:[#allocation5 + $0x1f8] sm:$0xff]   ;;  %v74_v10 = vpack.c.bf16 %v66_v8, %v66_v8  ;;  %v65_v12 = vld [vmem:[#allocation2 + $0x20] sm:$0xff] }
  0x4d   :  { %980 = vmatpush3.bf16.msra.mxu0 %v1116_v22  ;;  %v1156_v6 = vld [vmem:[#allocation5 + $0x138] sm:$0xff]   ;;  %v67_v13 = vld [vmem:[#allocation2 + $0x30] sm:$0xff]  ;;  %v73_v14 = vpack.c.bf16 %v65_v12, %v65_v12  ;;  %v1158_v16 = vld [vmem:[#allocation7] sm:$0xff]  }
  0x4e   :  { %1002 = vmatpush3.bf16.msra.mxu1 %v1117_v23  ;;  %981 = vmatprep.subr.bf16.mxu0 %v1118_v24  ;;  %v1157_v7 = vld [vmem:[#allocation5 + $0x1b8] sm:$0xff]   ;;  %v75_v15 = vpack.c.bf16 %v67_v13, %v67_v13  ;;  %v1159_v18 = vld [vmem:[#allocation7 + $0x8] sm:$0xff]   ;;  %v1160_v19 = vld [vmem:[#allocation7 + $0x10] sm:$0xff]  }
  0x4f   :  { %1003 = vmatprep.subr.bf16.mxu1 %v1119_v25  ;;  %v68_v9 = vld [vmem:[#allocation2 + $0x38] sm:$0xff]  ;;  %v1162_v21 = vld [vmem:[#allocation7 + $0x20] sm:$0xff]   ;;  %v1163_v22 = vld [vmem:[#allocation7 + $0x28] sm:$0xff]  }
  0x50   :  { %v76_v11 = vpack.c.bf16 %v68_v9, %v68_v9  ;;  %v1161_v20 = vld [vmem:[#allocation7 + $0x18] sm:$0xff]   ;;  %v1164_v23 = vld [vmem:[#allocation7 + $0x30] sm:$0xff]  }
  0x51   :  { %982 = vmatpush3.bf16.msra.mxu0 %v1120_v26  ;;  %v1165_v24 = vld [vmem:[#allocation7 + $0x38] sm:$0xff]  }
  0x52   :  { %1004 = vmatpush3.bf16.msra.mxu1 %v1121_v27  ;;  %983 = vmatprep.subr.bf16.mxu0 %v1122_v28  ;;  %v895_v27 = vld [vmem:[%s1364_s2] ss:$0 sm:$0xff] }
  0x53   :  { %1005 = vmatprep.subr.bf16.mxu1 %v1123_v29 }
  0x55   :  { %984 = vmatpush3.bf16.msra.mxu0 %v1124_v30 }
  0x56   :  { %1006 = vmatpush3.bf16.msra.mxu1 %v1125_v31  ;;  %1013 = vmatprep.subr.bf16.mxu0 %v1126_v40 }
  0x57   :  { %1035 = vmatprep.subr.bf16.mxu1 %v1127_v41 }
  0x58   :  { %629 = vmatmul.mubr.bf16.vlgmr.msra.gmra.mrb[0].mxu0 %v69_v37 }
  0x59   :  { %669 = vmatmul.mubr.bf16.vlgmr.msra.gmra.mrb[0].mxu1 %v71_v39  ;;  %1014 = vmatpush3.bf16.msra.mxu0 %v1128_v42 }
  0x5a   :  { %1036 = vmatpush3.bf16.msra.mxu1 %v1129_v43  ;;  %1015 = vmatprep.subr.bf16.mxu0 %v1130_v44 }
  0x5b   :  { %1037 = vmatprep.subr.bf16.mxu1 %v1131_v45  ;;  %708 = vmatprep.mubr.bf16.mxu0 %v74_v10 }
  0x5c   :  { %748 = vmatprep.mubr.bf16.mxu1 %v76_v11 }
  0x5d   :  { %1016 = vmatpush3.bf16.msra.mxu0 %v1132_v46 }
  0x5e   :  { %1038 = vmatpush3.bf16.msra.mxu1 %v1133_v47  ;;  %1017 = vmatprep.subr.bf16.mxu0 %v1134_v48 }
  0x5f   :  { %1039 = vmatprep.subr.bf16.mxu1 %v1135_v49 }
  0x61   :  { %1018 = vmatpush3.bf16.msra.mxu0 %v1136_v50 }
  0x62   :  { %1040 = vmatpush3.bf16.msra.mxu1 %v1137_v51  ;;  %1019 = vmatprep.subr.bf16.mxu0 %v1138_v52  ;;  %v960_v52 = vld [vmem:[%s1366_s4] ss:$0 sm:$0xff]  ;;  %s1236_s4 = scalar_lea.vmem %s886_s7, 128 }
  0x63   :  { %1041 = vmatprep.subr.bf16.mxu1 %v1139_v53  ;;  %p1237_p10 = scmp.ne.s32.totalorder %s886_s7, %s1236_s4  ;;  %p1242_p12 = scmp.lt.s32.totalorder %s1236_s4, %s1236_s4 }
  0x65   :  { %1020 = vmatpush3.bf16.msra.mxu0 %v1140_v54  ;;  %p1243_p13 = por %p1242_p12, %p1241_p11 }
  0x66   :  { %1042 = vmatpush3.bf16.msra.mxu1 %v1141_v55  ;;  %1021 = vmatprep.subr.bf16.mxu0 %v1142_v56 }
  0x67   :  { %1043 = vmatprep.subr.bf16.mxu1 %v1143_v57  ;;  %p1244_p0 = pnand %p1243_p13, %p1237_p10 }
  0x69   :  { %1022 = vmatpush3.bf16.msra.mxu0 %v1144_v58 }
  0x6a   :  { %1044 = vmatpush3.bf16.msra.mxu1 %v1145_v59  ;;  %1023 = vmatprep.subr.bf16.mxu0 %v1146_v60 }
  0x6b   :  { %1045 = vmatprep.subr.bf16.mxu1 %v1147_v61 }
  0x6d   :  { %1024 = vmatpush3.bf16.msra.mxu0 %v1148_v62 }
  0x6e   :  { %1046 = vmatpush3.bf16.msra.mxu1 %v1149_v63  ;;  %1025 = vmatprep.subr.bf16.mxu0 %v1150_v0 }
  0x6f   :  { %1047 = vmatprep.subr.bf16.mxu1 %v1151_v1 }
  0x71   :  { %1026 = vmatpush3.bf16.msra.mxu0 %v1152_v2 }
  0x72   :  { %1048 = vmatpush3.bf16.msra.mxu1 %v1153_v3  ;;  %1027 = vmatprep.subr.bf16.mxu0 %v1154_v4 }
  0x73   :  { %1049 = vmatprep.subr.bf16.mxu1 %v1155_v5 }
  0x75   :  { %1028 = vmatpush3.bf16.msra.mxu0 %v1156_v6 }
  0x76   :  { %1050 = vmatpush3.bf16.msra.mxu1 %v1157_v7  ;;  %1066 = vmatprep.subr.bf16.mxu0 %v1269_v17 }
  0x78   :  { %709 = vmatmul.mubr.bf16.vlgmr.msra.gmra.mrb[4].mxu0 %v73_v14 }
  0x79   :  { %749 = vmatmul.mubr.bf16.vlgmr.msra.gmra.mrb[4].mxu1 %v75_v15  ;;  %1067 = vmatpush3.bf16.msra.mxu0 %v1158_v16 }
  0x7a   :  { %1068 = vmatprep.subr.bf16.mxu0 %v1269_v17  ;;  %1082 = vmatprep.mubr.msk.bf16.mxu0 %vm1270_vm0, %v1269_v17 }
  0x7d   :  { %1069 = vmatpush3.bf16.msra.mxu0 %v1159_v18 }
  0x7e   :  { %1070 = vmatprep.subr.bf16.mxu0 %v1269_v17 }
  0x81   :  { %1071 = vmatpush3.bf16.msra.mxu0 %v1160_v19 }
  0x82   :  { %1072 = vmatprep.subr.bf16.mxu0 %v1269_v17 }
  0x85   :  { %1073 = vmatpush3.bf16.msra.mxu0 %v1161_v20 }
  0x86   :  { %1074 = vmatprep.subr.bf16.mxu0 %v1269_v17 }
  0x89   :  { %1075 = vmatpush3.bf16.msra.mxu0 %v1162_v21 }
  0x8a   :  { %1076 = vmatprep.subr.bf16.mxu0 %v1269_v17 }
  0x8d   :  { %1077 = vmatpush3.bf16.msra.mxu0 %v1163_v22 }
  0x8e   :  { %1078 = vmatprep.subr.bf16.mxu0 %v1269_v17 }
  0x91   :  { %1079 = vmatpush3.bf16.msra.mxu0 %v1164_v23 }
  0x92   :  { %1080 = vmatprep.subr.bf16.mxu0 %v1269_v17 }
  0x95   :  { %1081 = vmatpush3.bf16.msra.mxu0 %v1165_v24 }
 0x12b   :  { %v985_v25 = vpop.f32.mrb[0].mxu0 }
 0x12c   :  { %v1007_v26 = vpop.f32.mrb[0].mxu1  ;;  %v986_v28 = vpop.f32.mrb[1].mxu0 }
 0x12d   :  { %v1008_v29 = vpop.f32.mrb[1].mxu1  ;;  %v987_v30 = vadd.f32 %v986_v28, %v985_v25  ;;  %v988_v32 = vpop.f32.mrb[2].mxu0 }
 0x12e   :  { %v1009_v31 = vadd.f32 %v1008_v29, %v1007_v26  ;;  %v1010_v33 = vpop.f32.mrb[2].mxu1  ;;  %v989_v34 = vpop.f32.mrb[3].mxu0 }
 0x12f   :  { %v1011_v35 = vpop.f32.mrb[3].mxu1  ;;  %v631_v36 = vadd.f32 %v987_v30, %v895_v27 }
 0x131   :  { %v671_v37 = vadd.f32 %v1009_v31, %v631_v36 }
 0x14b   :  { %v1029_v38 = vpop.f32.mrb[4].mxu0 }
 0x14c   :  { %v1051_v39 = vpop.f32.mrb[4].mxu1  ;;  %v1030_v40 = vpop.f32.mrb[5].mxu0 }
 0x14d   :  { %v1031_v41 = vadd.f32 %v1030_v40, %v1029_v38  ;;  %v1052_v42 = vpop.f32.mrb[5].mxu1  ;;  %v1032_v43 = vpop.f32.mrb[6].mxu0 }
 0x14e   :  { %v1053_v44 = vadd.f32 %v1052_v42, %v1051_v39  ;;  %v1054_v45 = vpop.f32.mrb[6].mxu1  ;;  %v1033_v46 = vpop.f32.mrb[7].mxu0 }
 0x14f   :  { %v711_v47 = vadd.f32 %v1031_v41, %v671_v37  ;;  %v1055_v48 = vpop.f32.mrb[7].mxu1 }
 0x151   :  { %v751_v49 = vadd.f32 %v1053_v44, %v711_v47 }
 0x153   :  { %v756_v50 = vmax.f32 %v751_v49, 0.0 }
 0x155   :  { %v757_v51 = vpack.c.bf16 %v756_v50, %v756_v50 }
 0x157   :  { %1083 = vmatmul.mubr.bf16.vlgmr.msra.gmra.mrb[8].mxu0 %v757_v51 }
 0x22a   :  { %v863_v53 = vpop.f32.mrb[8].mxu0 }
 0x22b   :  { %v864_v54 = vadd.f32 %v960_v52, %v863_v53  ;;  %v1084_v55 = vpop.f32.mrb[9].mxu0 }
 0x22c   :  { %v866_v56 = vpop.f32.mrb[10].mxu0 }
 0x22d   :  { %869 = vmax.xlane.f32.xlu0 %v864_v54  ;;  %v1085_v57 = vpop.f32.mrb[11].mxu0 }
 0x2ba   :  { %v870_v58 = vpop.xlane.xlu0 %869 }
 0x2bb   :  { %v871_v59 = vsub.f32 %v864_v54, %v870_v58 }
 0x2bd   :  { %v872_v60 = vmul.f32 1.442695, %v871_v59 }
 0x2bf   :  { %1166 = vpow2.f32 %v872_v60 }
 0x2c9   :  { %v1167_v61 = vpop.eup %1166 }
 0x2ca   :  { %874 = vadd.xlane.f32.xlu0 %v1167_v61 }
 0x357   :  { %v875_v62 = vpop.xlane.xlu0 %874 }
 0x358   :  { %1168 = vrcp.f32 %v875_v62 }
 0x362   :  { %v1169_v63 = vpop.eup %1168 }
 0x363   :  { %v877_v0 = vmul.f32 %v1169_v63, %v1167_v61 }
 0x365   :  { %878 = vst [vmem:[#allocation8] sm:$0xff] %v877_v0 }
 0x366   :  { %1247 = shalt.err (!%p1244_p0)
}
 0x367   :  { %s1248_s10 = scalar_lea.hbm %s1367_s5, 128 }
 0x368   :  { %p1249_p1 = scmp.ne.s32.totalorder %s1367_s5, %s1248_s10  ;;  %p1252_p2 = scmp.lt.u32.totalorder %s1248_s10, %s1367_s5 }
 0x36a   :  { %p1254_p3 = pnand %p1252_p2, %p1249_p1 }
 0x36c   :  { %1257 = shalt.err (!%p1254_p3)
}
 0x36d   :  { %888 = dma.vmem_to_hbm [thread:$0]  %s886_s7, 128, %s1367_s5, [#allocation4]  }
 0x36e   :  { %1262 = dma.done.wait [#allocation4], 128  }
 0x36f   :  { %1263 = vsyncadd [#allocation4], 4294967168 }
 0x370   :  { %892 = vsyncpa [#allocation3], 1 }
 0x371   :  { %893 = vsyncpa [#allocation6], 1 }
 0x372   :  { %894 = vsyncpa [#allocation4], 1 }

</bundles_post_ra>
